<compile_context>
chip_gen: v7x
topology: tpu7x:2x2x1
jax: 0.10.0
libtpu: 0.0.40
codegen_flags: <defaults>
</compile_context>

<pallas_src>
import jax
import jax.numpy as jnp
from jax.experimental import pallas as pl
from jax.experimental.pallas import tpu as pltpu


# ----------------------------------------------------------------------------
# Kernel
# ----------------------------------------------------------------------------
def _make_qcp_kernel(num_k_steps):
    """Kernel factory; the (static) k-step count specializes the epilogue."""

    def kernel(scale_ref, x_ref, w_ref, bias_ref, o_ref):
        # scale_ref : SMEM (1,)     f32   quantization scale
        # x_ref     : VMEM (tm, tk) bf16  activation tile (pre-cast in wrapper)
        # w_ref     : VMEM (tk, tn) int8  weight tile (pre-transposed to [H, O])
        # bias_ref  : VMEM (1,  tn) f32   bias tile
        # o_ref     : VMEM (tm, tn) f32   output tile, resident across k
        partial = jnp.dot(
            x_ref[...],
            w_ref[...].astype(jnp.bfloat16),      # int8 values are exact in bf16
            preferred_element_type=jnp.float32,   # f32 MXU accumulation
        )

        if num_k_steps == 1:
            # Fully fused single pass: matmul + dequant scale + bias.
            o_ref[...] = partial * scale_ref[0] + bias_ref[...]
        else:
            k = pl.program_id(2)

            @pl.when(k == 0)
            def _():
                o_ref[...] = partial                      # init (no zero pass)

            @pl.when(jnp.logical_and(k > 0, k < num_k_steps - 1))
            def _():
                o_ref[...] += partial                     # accumulate

            @pl.when(k == num_k_steps - 1)
            def _():
                # Dequant epilogue fused into the final accumulate:
                # one tile read + one tile write, no separate scale pass.
                o_ref[...] = (o_ref[...] + partial) * scale_ref[0] + bias_ref[...]

    return kernel


# ----------------------------------------------------------------------------
# Helpers
# ----------------------------------------------------------------------------
def _round_up(x, m):
    return ((x + m - 1) // m) * m


def _pick_tile(dim, preferred, align):
    """Largest tile <= preferred that divides `dim` and is a multiple of
    `align`; falls back to the full dim (always a legal block shape)."""
    if dim <= preferred:
        return dim
    t = (preferred // align) * align
    while t >= align:
        if dim % t == 0:
            return t
        t -= align
    return dim


def _vmem_capacity_bytes():
    try:
        cap = int(pltpu.get_tpu_info().vmem_capacity_bytes)
        if cap > 0:
            return cap
    except Exception:
        pass
    return 64 * 1024 * 1024   # conservative default (v7x per-TC VMEM)


def _num_tensorcores():
    try:
        info = pltpu.get_tpu_info()
        for name in ("num_cores", "core_count", "num_tensorcores",
                     "tensorcores_per_chip"):
            v = getattr(info, name, None)
            if v is not None:
                v = int(v)
                if v > 0:
                    return v
    except Exception:
        pass
    return 1


# ----------------------------------------------------------------------------
# Wrapper
# ----------------------------------------------------------------------------
def quantized_column_parallel_forward(x, weight_i8, scale, bias,
                                      *, tm=512, tn=512, tk=2048):
    """Forward of QuantizedColumnParallel (world_size==1, gather_output=True).

    x         : [B, S, H] float   (module layout: [batch, sequence, hidden])
    weight_i8 : [O, H]    int8    column-parallel weight shard (full layer here)
    scale     : [1]       f32     scalar quantization scale
    bias      : [O]       f32
    returns   : [B, S, O] f32     == x @ (W.astype(f32) * scale).T + bias

    Note: the matmul is computed in bf16 (f32 accumulation). int8 weights are
    exact in bf16; the activation cast is the only rounding vs. the module's
    f32 dequant semantics (precision/perf knob).
    """
    B, S, H = x.shape
    O, H2 = weight_i8.shape
    assert H == H2
    M = B * S

    # Activations: flatten tokens, compute in bf16 (halves HBM re-stream
    # traffic and VMEM footprint, removes the per-step in-kernel cast).
    x2d = x.reshape(M, H).astype(jnp.bfloat16)

    # Weight: one-time transpose of the static int8 tensor to [H, O] so the
    # kernel contracts canonically [tm,tk] x [tk,tn] (no per-step relayout).
    w_t = weight_i8.T                                   # [H, O] int8
    bias2d = bias.astype(jnp.float32).reshape(1, O)
    scale = scale.astype(jnp.float32).reshape(1)

    # --- tile selection ----------------------------------------------------
    # tm aligned to 16 (bf16 packs two rows per sublane); pad M up so tm
    # divides exactly — no huge fallback block can blow past the VMEM budget.
    tm = max(16, (min(tm, 512) // 16) * 16)
    if M > tm:
        Mp = _round_up(M, tm)
    else:
        Mp = _round_up(M, 16)
        tm = Mp
    if Mp != M:
        x2d = jnp.pad(x2d, ((0, Mp - M), (0, 0)))

    tn = _pick_tile(O, tn, 128)
    tk = _pick_tile(H, min(tk, 2048), 128)

    # Megacore (multi-TensorCore chips only): ensure >= 2 parallel grid steps
    # by splitting the row axis first (keeps the output store lane-dense).
    if _num_tensorcores() > 1:
        while (Mp // tm) * (O // tn) < 2 and tm % 32 == 0:
            tm //= 2
        # TODO(synk): halve tn only as a last resort and only while tn >= 512.

    assert Mp % tm == 0 and O % tn == 0 and H % tk == 0
    gi, gj, gk = Mp // tm, O // tn, H // tk
    grid = (gi, gj, gk)

    # --- VMEM budget (generation-aware cap) ---------------------------------
    est_bytes = (2 * tm * tk * 2       # x tiles (bf16), double-buffered
                 + 2 * tk * tn * 1     # weight tiles (int8), double-buffered
                 + 2 * tm * tn * 4     # resident output tiles (f32)
                 + 2 * tn * 4          # bias tiles
                 + tk * tn * 2         # in-kernel bf16 cast of the weight tile
                 + tm * tn * 4)        # epilogue / relayout headroom
    cap = (_vmem_capacity_bytes() * 3) // 4   # ~48 MiB v7x, ~96 MiB v5e/v6e
    vmem_limit_bytes = int(min(max(2 * est_bytes, 16 * 1024 * 1024), cap))

    # --- cost estimate reflecting actual HBM re-streaming -------------------
    cost = pl.CostEstimate(
        flops=2 * Mp * O * H,
        transcendentals=0,
        bytes_accessed=(gi * O * H * 1        # int8 weights re-read gi times
                        + gj * Mp * H * 2     # bf16 activations re-read gj times
                        + Mp * O * 4          # f32 output written once
                        + gi * O * 4          # bias re-read gi times
                        + 4),                 # scale
    )

    out2d = pl.pallas_call(
        _make_qcp_kernel(gk),
        out_shape=jax.ShapeDtypeStruct((Mp, O), jnp.float32),
        grid_spec=pltpu.PrefetchScalarGridSpec(
            num_scalar_prefetch=0,
            grid=grid,
            in_specs=[
                pl.BlockSpec(memory_space=pltpu.SMEM),             # scale (scalar)
                pl.BlockSpec((tm, tk), lambda i, j, k: (i, k)),    # x tile (bf16)
                pl.BlockSpec((tk, tn), lambda i, j, k: (k, j)),    # W^T tile (int8)
                pl.BlockSpec((1, tn), lambda i, j, k: (0, j)),     # bias tile
            ],
            out_specs=pl.BlockSpec((tm, tn), lambda i, j, k: (i, j)),
        ),
        compiler_params=pltpu.CompilerParams(
            dimension_semantics=("parallel", "parallel", "arbitrary"),
            vmem_limit_bytes=vmem_limit_bytes,
        ),
        cost_estimate=cost,
    )(scale, x2d, w_t, bias2d)

    if Mp != M:
        out2d = out2d[:M]
    return out2d.reshape(B, S, O)


# ----------------------------------------------------------------------------
# Self-test
# ----------------------------------------------------------------------------
if __name__ == "__main__":
    # Small shapes consistent with the module's [batch, sequence, hidden] input.
    B, S, H, O = 2, 8, 256, 256

    key = jax.random.PRNGKey(0)
    kx, kw, kb = jax.random.split(key, 3)

    # Deterministic synthetic parameters (module inits to zeros; checkpoints
    # normally fill them — seeded values make the test non-trivial).
    x = jax.random.normal(kx, (B, S, H), dtype=jnp.float32)
    weight_i8 = jax.random.randint(kw, (O, H), -128, 128, dtype=jnp.int8)
    scale = jnp.array([0.02], dtype=jnp.float32)
    bias = jax.random.normal(kb, (O,), dtype=jnp.float32)

    # Default tiling (single fused k step at these shapes).
    out = quantized_column_parallel_forward(x, weight_i8, scale, bias)
    out = jax.block_until_ready(out)
    assert out.shape == (B, S, O)

    # Force a multi-step (i, j, k) grid to exercise the accumulation path and
    # the fused final-k dequant epilogue.
    out_small = quantized_column_parallel_forward(x, weight_i8, scale, bias,
                                                  tm=16, tn=128, tk=128)
    out_small = jax.block_until_ready(out_small)
    assert jnp.allclose(out, out_small, atol=1e-3, rtol=1e-3)

    # Tight check against a reference using identical bf16-activation numerics
    # (int8 weights exact in bf16; f32 accumulation).
    ref_bf = (jnp.einsum("bsh,oh->bso",
                         x.astype(jnp.bfloat16), weight_i8.astype(jnp.bfloat16),
                         preferred_element_type=jnp.float32)
              * scale[0] + bias)
    assert jnp.allclose(out, ref_bf, atol=2e-3, rtol=2e-3)

    # Sanity check against the module's exact f32 dequant semantics; the bf16
    # activation cast is the only deviation (documented precision/perf knob).
    w_deq = weight_i8.astype(jnp.float32) * scale[0]
    ref_f32 = jnp.einsum("bsh,oh->bso", x, w_deq) + bias
    tol = 5e-3 * jnp.max(jnp.abs(ref_f32)) + 1e-3
    assert jnp.max(jnp.abs(out - ref_f32)) <= tol

    print("KERNEL_OK")
</pallas_src>

<mosaic_0001>
module attributes {stable_mosaic.version = 11 : i64} {
  func.func @kernel(%arg0: i32, %arg1: i32, %arg2: i32, %arg3: memref<1xf32, #tpu.memory_space<smem>>, %arg4: memref<16x256xbf16, #tpu.memory_space<vmem>>, %arg5: memref<256x256xi8, #tpu.memory_space<vmem>>, %arg6: memref<1x256xf32, #tpu.memory_space<vmem>>, %arg7: memref<16x256xf32, #tpu.memory_space<vmem>>) attributes {dimension_semantics = [#tpu.dimension_semantics<parallel>, #tpu.dimension_semantics<parallel>, #tpu.dimension_semantics<arbitrary>], iteration_bounds = array<i64: 1, 1, 1>, scalar_prefetch = 0 : i64, scratch_operands = 0 : i64, tpu.core_type = #tpu.core_type<tc>, window_params = [{transform_indices = @transform_0, window_bounds = array<i64: 1>}, {transform_indices = @transform_1, window_bounds = array<i64: 16, 256>}, {transform_indices = @transform_2, window_bounds = array<i64: 256, 256>}, {transform_indices = @transform_3, window_bounds = array<i64: 1, 256>}, {transform_indices = @transform_4, window_bounds = array<i64: 16, 256>}]} {
    %c0 = arith.constant 0 : index
    %c0_0 = arith.constant 0 : index
    %0 = vector.load %arg4[%c0, %c0_0] : memref<16x256xbf16, #tpu.memory_space<vmem>>, vector<16x256xbf16>
    %c0_1 = arith.constant 0 : index
    %c0_2 = arith.constant 0 : index
    %1 = vector.load %arg5[%c0_1, %c0_2] : memref<256x256xi8, #tpu.memory_space<vmem>>, vector<256x256xi8>
    %2 = arith.sitofp %1 : vector<256x256xi8> to vector<256x256xbf16>
    %cst = arith.constant dense<0.000000e+00> : vector<16x256xf32>
    %3 = tpu.matmul %0, %2, %cst {dimension_numbers = #tpu.dot_dimension_numbers<[1], [0], [0], [1], [0, 0, 1, 1], [], []>} : vector<16x256xbf16>, vector<256x256xbf16>, vector<16x256xf32> -> vector<16x256xf32>
    %c0_3 = arith.constant 0 : index
    %4 = memref.load %arg3[%c0_3] : memref<1xf32, #tpu.memory_space<smem>>
    %5 = vector.broadcast %4 : f32 to vector<16x256xf32>
    %6 = arith.mulf %3, %5 : vector<16x256xf32>
    %c0_4 = arith.constant 0 : index
    %c0_5 = arith.constant 0 : index
    %7 = vector.load %arg6[%c0_4, %c0_5] : memref<1x256xf32, #tpu.memory_space<vmem>>, vector<1x256xf32>
    %8 = vector.broadcast %7 : vector<1x256xf32> to vector<16x256xf32>
    %9 = arith.addf %6, %8 : vector<16x256xf32>
    %c0_6 = arith.constant 0 : index
    %c0_7 = arith.constant 0 : index
    %10 = vector.load %arg7[%c0_6, %c0_7] : memref<16x256xf32, #tpu.memory_space<vmem>>, vector<16x256xf32>
    tpu.vector_store %arg7[%c0_6, %c0_7], %9 {strides = array<i32>} : memref<16x256xf32, #tpu.memory_space<vmem>>, vector<16x256xf32>,
    return
  }
  func.func @transform_0(%arg0: i32, %arg1: i32, %arg2: i32) -> i32 {
    %c0_i32 = arith.constant 0 : i32
    %c0_i32_0 = arith.constant 0 : i32
    return %c0_i32 : i32
  }
  func.func @transform_1(%arg0: i32, %arg1: i32, %arg2: i32) -> (i32, i32) {
    %c0_i32 = arith.constant 0 : i32
    return %arg0, %arg2 : i32, i32
  }
  func.func @transform_2(%arg0: i32, %arg1: i32, %arg2: i32) -> (i32, i32) {
    %c0_i32 = arith.constant 0 : i32
    return %arg2, %arg1 : i32, i32
  }
  func.func @transform_3(%arg0: i32, %arg1: i32, %arg2: i32) -> (i32, i32) {
    %c0_i32 = arith.constant 0 : i32
    %c0_i32_0 = arith.constant 0 : i32
    return %c0_i32, %arg1 : i32, i32
  }
  func.func @transform_4(%arg0: i32, %arg1: i32, %arg2: i32) -> (i32, i32) {
    %c0_i32 = arith.constant 0 : i32
    return %arg0, %arg1 : i32, i32
  }
}

</mosaic_0001>

<bundles_post_ra>
// kernel: tpu_custom_call.1
= control target key start
LH: loop header
LB: loop body
LE: loop exit
PB: predicated region body
PF: predicated region fallthrough
CT: control target
= control target key end

     0   :  { %10 = vsyncpa [#allocation4], 0  ;;  %s358_s0 = inlined_call_operand.<no memory space> [shape: f32[1], index: 0, kind: input, shape index: {}]   ;;  %s359_s1 = inlined_call_operand.hbm [shape: bf16[16,256], index: 1, kind: input, shape index: {}]   ;;  %s360_s2 = inlined_call_operand.hbm [shape: s8[256,256], index: 2, kind: input, shape index: {}]   ;;  %s361_s3 = inlined_call_operand.vmem [shape: f32[1,256], index: 3, kind: input, shape index: {}]   ;;  %s362_s4 = inlined_call_operand.hbm [shape: f32[16,256], index: 4, kind: output, shape index: {}]  }
   0x1   :  { %11 = vsyncpa [#allocation7], 0 }
   0x2   :  { %12 = vsyncpa [#allocation5], 0  ;;  %s278_s15 = smov [#allocation3]   ;;  %s206_s19 = scalar_lea.hbm %s359_s1, 256 }
   0x3   :  { %s20_s16 = sshll.u32 %s278_s15, 4  ;;  %p207_p0 = scmp.ne.s32.totalorder %s359_s1, %s206_s19  ;;  %s21_s16 = int_to_ptr.vmem [resolvable:$true] %s20_s16 }
   0x4   :  { %p210_p1 = scmp.lt.u32.totalorder %s206_s19, %s359_s1 }
   0x6   :  { %p212_p2 = pnand %p210_p1, %p207_p0 }
   0x8   :  { %215 = shalt.err (!%p212_p2)
}
   0x9   :  { %s216_s24 = scalar_lea.vmem %s21_s16, 256  ;;  %p221_p4 = scmp.lt.s32.totalorder %s21_s16, %s21_s16 }
   0xa   :  { %p217_p3 = scmp.ne.s32.totalorder %s21_s16, %s216_s24  ;;  %p222_p5 = scmp.lt.s32.totalorder %s216_s24, %s216_s24 }
   0xc   :  { %p223_p6 = por %p222_p5, %p221_p4 }
   0xe   :  { %p224_p7 = pnand %p223_p6, %p217_p3 }
  0x10   :  { %227 = shalt.err (!%p224_p7)
}
  0x11   :  { %s279_s25 = smov 128   ;;  %s280_s26 = smov 8  }
  0x12   :  { %26 = dma.hbm_to_vmem [thread:$0]  %s359_s1, 256, %s21_s16, [#allocation4], %s279_s25, %s279_s25, %s280_s26  }
  0x13   :  { %s281_s29 = smov [#allocation6]   ;;  %s228_s7 = scalar_lea.hbm %s360_s2, 2048 }
  0x14   :  { %s32_s30 = sshll.u32 %s281_s29, 4  ;;  %p229_p8 = scmp.ne.s32.totalorder %s360_s2, %s228_s7  ;;  %s33_s30 = int_to_ptr.vmem [resolvable:$true] %s32_s30 }
  0x15   :  { %p232_p9 = scmp.lt.u32.totalorder %s228_s7, %s360_s2 }
  0x17   :  { %p234_p10 = pnand %p232_p9, %p229_p8 }
  0x19   :  { %237 = shalt.err (!%p234_p10)
}
  0x1a   :  { %s238_s12 = scalar_lea.vmem %s33_s30, 2048  ;;  %p243_p12 = scmp.lt.s32.totalorder %s33_s30, %s33_s30 }
  0x1b   :  { %p239_p11 = scmp.ne.s32.totalorder %s33_s30, %s238_s12  ;;  %p244_p13 = scmp.lt.s32.totalorder %s238_s12, %s238_s12 }
  0x1d   :  { %p245_p0 = por %p244_p13, %p243_p12 }
  0x1f   :  { %p246_p1 = pnand %p245_p0, %p239_p11 }
  0x21   :  { %249 = shalt.err (!%p246_p1)
}
  0x22   :  { %s282_s1 = smov 256   ;;  %s283_s13 = smov 16  }
  0x23   :  { %38 = dma.hbm_to_vmem [thread:$0]  %s360_s2, 2048, %s33_s30, [#allocation7], %s282_s1, %s282_s1, %s283_s13  }
  0x24   :  { %272 = dma.done.wait [#allocation4], 256  }
  0x25   :  { %273 = vsyncadd [#allocation4], 4294967040 }
  0x26   :  { %274 = dma.done.wait [#allocation7], 2048  }
  0x27   :  { %275 = vsyncadd [#allocation7], 4294965248  ;;  %v50_v0 = vld [vmem:[#allocation6 + $0x8] sm:$0xff]  ;;  %v49_v1 = vld [vmem:[#allocation6] sm:$0xff]  ;;  %v158_v50 = vlaneseq  ;;  %v151_v55 = vstv %s358_s0  ;;  %s284_s19 = smov [#allocation8]  }
  0x28   :  { %v66_v2 = vunpack.c.l.s8.bf16 %v50_v0  ;;  %v68_v3 = vunpack.c.h.s8.bf16 %v50_v0  ;;  %v65_v4 = vunpack.c.l.s8.bf16 %v49_v1  ;;  %v52_v5 = vld [vmem:[#allocation6 + $0x18] sm:$0xff]  ;;  %v67_v6 = vunpack.c.h.s8.bf16 %v49_v1  ;;  %v51_v8 = vld [vmem:[#allocation6 + $0x10] sm:$0xff]  ;;  %v54_v12 = vld [vmem:[#allocation6 + $0x28] sm:$0xff]  ;;  %s181_s20 = sshll.u32 %s284_s19, 4  ;;  %s182_s20 = int_to_ptr.vmem [resolvable:$true] %s181_s20 }
  0x29   :  { %v70_v7 = vunpack.c.l.s8.bf16 %v52_v5  ;;  %v205_v9 = vld [vmem:[#allocation3 + $0x4] ss:$8 sps:$4 sm:$0xff]   ;;  %v69_v10 = vunpack.c.l.s8.bf16 %v51_v8  ;;  %v72_v11 = vunpack.c.h.s8.bf16 %v52_v5  ;;  %v71_v13 = vunpack.c.h.s8.bf16 %v51_v8  ;;  %v53_v15 = vld [vmem:[#allocation6 + $0x20] sm:$0xff]  ;;  %v58_v24 = vld [vmem:[#allocation6 + $0x48] sm:$0xff]  ;;  %s250_s0 = scalar_lea.vmem %s182_s20, 512  ;;  %p255_p3 = scmp.lt.s32.totalorder %s182_s20, %s182_s20 }
  0x2a   :  { %107 = vmatprep.subr.bf16.mxu0 %v66_v2  ;;  %139 = vmatprep.mubr.bf16.mxu0 %v205_v9  ;;  %v74_v14 = vunpack.c.l.s8.bf16 %v54_v12  ;;  %v73_v16 = vunpack.c.l.s8.bf16 %v53_v15  ;;  %v76_v17 = vunpack.c.h.s8.bf16 %v54_v12  ;;  %v56_v18 = vld [vmem:[#allocation6 + $0x38] sm:$0xff]  ;;  %v75_v19 = vunpack.c.h.s8.bf16 %v53_v15  ;;  %v55_v21 = vld [vmem:[#allocation6 + $0x30] sm:$0xff]  ;;  %v57_v27 = vld [vmem:[#allocation6 + $0x40] sm:$0xff]  ;;  %p251_p2 = scmp.ne.s32.totalorder %s182_s20, %s250_s0  ;;  %p256_p4 = scmp.lt.s32.totalorder %s250_s0, %s250_s0 }
  0x2b   :  { %108 = vmatpush1.bf16.msra.mxu0 %v65_v4  ;;  %v78_v20 = vunpack.c.l.s8.bf16 %v56_v18  ;;  %v77_v22 = vunpack.c.l.s8.bf16 %v55_v21  ;;  %v80_v23 = vunpack.c.h.s8.bf16 %v56_v18  ;;  %v79_v25 = vunpack.c.h.s8.bf16 %v55_v21  ;;  %v60_v30 = vld [vmem:[#allocation6 + $0x58] sm:$0xff]  ;;  %v59_v33 = vld [vmem:[#allocation6 + $0x50] sm:$0xff]  ;;  %v62_v36 = vld [vmem:[#allocation6 + $0x68] sm:$0xff] }
  0x2c   :  { %109 = vmatprep.subr.bf16.mxu0 %v68_v3  ;;  %v82_v26 = vunpack.c.l.s8.bf16 %v58_v24  ;;  %v81_v28 = vunpack.c.l.s8.bf16 %v57_v27  ;;  %v84_v29 = vunpack.c.h.s8.bf16 %v58_v24  ;;  %v83_v31 = vunpack.c.h.s8.bf16 %v57_v27  ;;  %v61_v39 = vld [vmem:[#allocation6 + $0x60] sm:$0xff]  ;;  %v64_v42 = vld [vmem:[#allocation6 + $0x78] sm:$0xff]  ;;  %v63_v45 = vld [vmem:[#allocation6 + $0x70] sm:$0xff]  ;;  %p257_p5 = por %p256_p4, %p255_p3 }
  0x2d   :  { %v86_v32 = vunpack.c.l.s8.bf16 %v60_v30  ;;  %v85_v34 = vunpack.c.l.s8.bf16 %v59_v33  ;;  %v88_v35 = vunpack.c.h.s8.bf16 %v60_v30  ;;  %v87_v37 = vunpack.c.h.s8.bf16 %v59_v33  ;;  %v203_v49 = vld [vmem:[#allocation3] ss:$8 sps:$4 sm:$0xff]  }
  0x2e   :  { %v90_v38 = vunpack.c.l.s8.bf16 %v62_v36  ;;  %v89_v40 = vunpack.c.l.s8.bf16 %v61_v39  ;;  %v92_v41 = vunpack.c.h.s8.bf16 %v62_v36  ;;  %v91_v43 = vunpack.c.h.s8.bf16 %v61_v39  ;;  %v156_v53 = vld [vmem:[%s361_s3] sm:$0x3]  ;;  %p258_p6 = pnand %p257_p5, %p251_p2 }
  0x2f   :  { %110 = vmatpush1.bf16.msra.mxu0 %v67_v6  ;;  %v94_v44 = vunpack.c.l.s8.bf16 %v64_v42  ;;  %v93_v46 = vunpack.c.l.s8.bf16 %v63_v45  ;;  %v96_v47 = vunpack.c.h.s8.bf16 %v64_v42  ;;  %v95_v48 = vunpack.c.h.s8.bf16 %v63_v45 }
  0x30   :  { %111 = vmatprep.subr.bf16.mxu0 %v70_v7  ;;  %v159_v51 = vshrl.u32 %v158_v50, 7 }
  0x32   :  { %v160_v52 = vsub.s32 0, %v159_v51  ;;  %v164_v54 = vsub.s32 1, %v159_v51 }
  0x33   :  { %112 = vmatpush1.bf16.msra.mxu0 %v69_v10 }
  0x34   :  { %113 = vmatprep.subr.bf16.mxu0 %v72_v11  ;;  %v161_v56 = vrot.slane %v156_v53, %v160_v52  ;;  %v165_v58 = vrot.slane %v156_v53, %v164_v54 }
  0x37   :  { %114 = vmatpush1.bf16.msra.mxu0 %v71_v13 }
  0x38   :  { %115 = vmatprep.subr.bf16.mxu0 %v74_v14 }
  0x3b   :  { %116 = vmatpush1.bf16.msra.mxu0 %v73_v16 }
  0x3c   :  { %117 = vmatprep.subr.bf16.mxu0 %v76_v17 }
  0x3f   :  { %118 = vmatpush1.bf16.msra.mxu0 %v75_v19 }
  0x40   :  { %119 = vmatprep.subr.bf16.mxu0 %v78_v20 }
  0x43   :  { %120 = vmatpush1.bf16.msra.mxu0 %v77_v22 }
  0x44   :  { %121 = vmatprep.subr.bf16.mxu0 %v80_v23 }
  0x47   :  { %122 = vmatpush1.bf16.msra.mxu0 %v79_v25 }
  0x48   :  { %123 = vmatprep.subr.bf16.mxu0 %v82_v26 }
  0x4b   :  { %124 = vmatpush1.bf16.msra.mxu0 %v81_v28 }
  0x4c   :  { %125 = vmatprep.subr.bf16.mxu0 %v84_v29 }
  0x4f   :  { %126 = vmatpush1.bf16.msra.mxu0 %v83_v31 }
  0x50   :  { %127 = vmatprep.subr.bf16.mxu0 %v86_v32 }
  0x53   :  { %128 = vmatpush1.bf16.msra.mxu0 %v85_v34 }
  0x54   :  { %129 = vmatprep.subr.bf16.mxu0 %v88_v35 }
  0x57   :  { %130 = vmatpush1.bf16.msra.mxu0 %v87_v37 }
  0x58   :  { %131 = vmatprep.subr.bf16.mxu0 %v90_v38 }
  0x5b   :  { %132 = vmatpush1.bf16.msra.mxu0 %v89_v40 }
  0x5c   :  { %133 = vmatprep.subr.bf16.mxu0 %v92_v41 }
  0x5f   :  { %134 = vmatpush1.bf16.msra.mxu0 %v91_v43 }
  0x60   :  { %135 = vmatprep.subr.bf16.mxu0 %v94_v44 }
  0x63   :  { %136 = vmatpush1.bf16.msra.mxu0 %v93_v46 }
  0x64   :  { %137 = vmatprep.subr.bf16.mxu0 %v96_v47 }
  0x67   :  { %138 = vmatpush1.bf16.msra.mxu0 %v95_v48 }
  0x6a   :  { %140 = vmatmul.mubr.bf16.vlgmr.msra.gmra.mrb[0].mxu0 %v203_v49 }
 0x13d   :  { %v141_v57 = vpop.f32.mrb[0].mxu0 }
 0x13e   :  { %v152_v59 = vmul.f32 %v151_v55, %v141_v57  ;;  %v143_v60 = vpop.f32.mrb[1].mxu0 }
 0x13f   :  { %v153_v61 = vmul.f32 %v151_v55, %v143_v60  ;;  %v145_v62 = vpop.f32.mrb[2].mxu0 }
 0x140   :  { %v168_v63 = vadd.f32 %v161_v56, %v152_v59  ;;  %v154_v0 = vmul.f32 %v151_v55, %v145_v62  ;;  %v147_v1 = vpop.f32.mrb[3].mxu0 }
 0x141   :  { %v169_v2 = vadd.f32 %v165_v58, %v153_v61  ;;  %v155_v3 = vmul.f32 %v151_v55, %v147_v1 }
 0x142   :  { %172 = vst [vmem:[#allocation8] sm:$0xff] %v168_v63  ;;  %v170_v4 = vadd.f32 %v161_v56, %v154_v0 }
 0x143   :  { %173 = vst [vmem:[#allocation8 + $0x8] sm:$0xff] %v169_v2  ;;  %v171_v5 = vadd.f32 %v165_v58, %v155_v3 }
 0x144   :  { %174 = vst [vmem:[#allocation8 + $0x10] sm:$0xff] %v170_v4 }
 0x145   :  { %175 = vst [vmem:[#allocation8 + $0x18] sm:$0xff] %v171_v5 }
 0x146   :  { %261 = shalt.err (!%p258_p6)
}
 0x147   :  { %s262_s22 = scalar_lea.hbm %s362_s4, 512 }
 0x148   :  { %p263_p7 = scmp.ne.s32.totalorder %s362_s4, %s262_s22  ;;  %p266_p8 = scmp.lt.u32.totalorder %s262_s22, %s362_s4 }
 0x14a   :  { %p268_p9 = pnand %p266_p8, %p263_p7 }
 0x14c   :  { %271 = shalt.err (!%p268_p9)
}
 0x14d   :  { %187 = dma.vmem_to_hbm [thread:$0]  %s182_s20, 512, %s362_s4, [#allocation5], %s282_s1, %s282_s1, %s283_s13  }
 0x14e   :  { %276 = dma.done.wait [#allocation5], 512  }
 0x14f   :  { %277 = vsyncadd [#allocation5], 4294966784 }
 0x150   :  { %191 = vsyncpa [#allocation4], 1 }
 0x151   :  { %192 = vsyncpa [#allocation7], 1 }
 0x152   :  { %193 = vsyncpa [#allocation5], 1 }

</bundles_post_ra>
